<compile_context>
chip_gen: v6e
topology: v6e:2x2x1
jax: 0.10.0
libtpu: 0.0.40
codegen_flags: <defaults>
</compile_context>

<pallas_src>
import functools

import jax
import jax.numpy as jnp
import numpy as np
from jax.experimental import pallas as pl
from jax.experimental.pallas import tpu as pltpu


# ----------------------------------------------------------------------------
# The fused Pallas kernel
# ----------------------------------------------------------------------------
def _vgg_cnnc_kernel(roll_jnp_like,
                     xp1_ref,
                     wb1_ref, bb1_ref, sx1_ref, sy1e_ref, sy1o_ref,
                     wb2_ref, bb2_ref, sx2_ref, sy2e_ref, sy2o_ref,
                     wb3_hbm, bb3_ref,
                     fw1_hbm, fb1_ref, fw2_ref, fb2_ref,
                     out_ref,
                     fw1_vmem, fw1_sem, wb3_vmem, wb3_sem,
                     xp2_scr, xp3_scr, a3_scr):
    f32 = jnp.float32
    bf16 = jnp.bfloat16
    B = out_ref.shape[0]

    # (1) Start the two largest weight DMAs now so they overlap the conv/pool
    #     compute (the kernel is weight-DMA / latency bound at small batch).
    fw1_cp = pltpu.make_async_copy(fw1_hbm, fw1_vmem, fw1_sem)
    fw1_cp.start()
    wb3_cp = pltpu.make_async_copy(wb3_hbm, wb3_vmem, wb3_sem)
    wb3_cp.start()

    def conv3x3_relu(load_win, wb_ref, bb_ref, h_out):
        # Rows are (y, batch) batch-minor, lanes are (x, cin).  The banded
        # weight matrices carry the kx taps (with x zero-padding), so a 'same'
        # 3x3 conv is three sublane-shifted 2-D MXU matmuls (shift = B rows).
        m = h_out * B
        acc = jnp.dot(load_win(0, m), wb_ref[0], preferred_element_type=f32)
        acc = acc + jnp.dot(load_win(1, m), wb_ref[1], preferred_element_type=f32)
        acc = acc + jnp.dot(load_win(2, m), wb_ref[2], preferred_element_type=f32)
        return jnp.maximum(acc + bb_ref[...], 0.0)          # (h_out*B, W*Cout) f32

    def xpool(a, c, sxe_ref):
        # 2:1 max-pool along x: a lane roll by one channel group pairs x with
        # x+1 (XLU slot, off the MXU/DMA critical path), max in f32, then one
        # 0/1 even-phase selector matmul.  The circular wrap pairs x=W-1 with
        # x=0, but odd x is never selected by sxe, so it is harmless.
        lanes = a.shape[1]
        shift = (lanes - c) if roll_jnp_like else c          # brings lane l+c to l
        pm = jnp.maximum(a, pltpu.roll(a, shift, axis=1))
        return jnp.dot(pm.astype(bf16), sxe_ref[...], preferred_element_type=f32)

    def ypool_pad(xm, sye_ref, syo_ref):
        # 2:1 max-pool along y, emitted directly in the next conv's y-padded
        # layout (pad rows come out exactly 0) via two tiny 0/1 row-selection
        # matmuls -- selectors are only (B*(H/2+2), B*H) in batch-minor layout.
        xm_bf = xm.astype(bf16)
        return jnp.maximum(
            jnp.dot(sye_ref[...], xm_bf, preferred_element_type=f32),
            jnp.dot(syo_ref[...], xm_bf, preferred_element_type=f32))

    # features: [Conv(1->32)+ReLU, MaxPool2, Conv(32->64)+ReLU, MaxPool2,
    #            Conv(64->128)+ReLU] on a 16x16 input.
    def win1(k, m):                                          # ref reads, not value
        return xp1_ref[pl.ds(k * B, m), :].astype(bf16)      # slices -> no relayout
    a1 = conv3x3_relu(win1, wb1_ref, bb1_ref, 16)            # (16B, 16*32) f32
    xp2_scr[...] = ypool_pad(xpool(a1, 32, sx1_ref), sy1e_ref, sy1o_ref)

    def win2(k, m):
        return xp2_scr[pl.ds(k * B, m), :].astype(bf16)
    a2 = conv3x3_relu(win2, wb2_ref, bb2_ref, 8)             # (8B, 8*64) f32
    xp3_scr[...] = ypool_pad(xpool(a2, 64, sx2_ref), sy2e_ref, sy2o_ref)

    wb3_cp.wait()                                            # conv3 weights resident
    def win3(k, m):
        return xp3_scr[pl.ds(k * B, m), :].astype(bf16)
    a3_scr[...] = conv3x3_relu(win3, wb3_vmem, bb3_ref, 4)   # (4B, 4*128) f32

    # classifier: Linear(2048, 512) + ReLU + Dropout + Linear(512, 1).
    # torch.flatten's (c, y, x) order is folded host-side into fw1 (4, 512, 512):
    #   h[b] = sum_y a3[y*B + b] @ fw1[y]
    feats = [a3_scr[pl.ds(y * B, B), :].astype(bf16) for y in range(4)]
    fw1_cp.wait()                                            # FC1 weights resident
    h = fb1_ref[...]                                         # (1, 512) f32
    for y in range(4):
        h = h + jnp.dot(feats[y], fw1_vmem[y], preferred_element_type=f32)
    h = jnp.maximum(h, 0.0)
    # nn.Dropout(p): identity at inference.  # TODO(synk): training-mode dropout mask
    # Final Linear has N=1 -> VPU multiply + lane reduction instead of MXU.
    out = jnp.sum(h * fw2_ref[...], axis=1, keepdims=True) + fb2_ref[...]
    out_ref[...] = out.astype(out_ref.dtype)


def _full_spec(arr):
    nd = arr.ndim
    return pl.BlockSpec(arr.shape, lambda: (0,) * nd)


_OPERAND_ORDER = ("wb1", "bb1", "sx1", "sy1e", "sy1o",
                  "wb2", "bb2", "sx2", "sy2e", "sy2o",
                  "wb3", "bb3",
                  "fw1", "fb1", "fw2", "fb2")
_HBM_OPERANDS = frozenset({"wb3", "fw1"})   # manually DMA'd inside the kernel


def vgg_cnnc_forward(kin, x_nchw, *, roll_jnp_like=True):
    """Forward pass matching VGG_CNNC.forward (inference semantics)."""
    B = x_nchw.shape[0]
    assert x_nchw.shape[2:] == (16, 16), "classifier hard-codes 128*4*4 features"
    # if x.size(1) != 1: x = unsqueeze(x[:, 0, :, :], 1)  -> channel 0 either way
    x2 = x_nchw[:, 0, :, :].astype(jnp.float32)                 # (B, 16, 16)
    # y-padded, batch-minor 2-D layout: row = y_pad*B + b, lanes = x.
    xp1 = jnp.pad(x2, ((0, 0), (1, 1), (0, 0)))                 # (B, 18, 16)
    xp1 = jnp.transpose(xp1, (1, 0, 2)).reshape(18 * B, 16)

    operands = [xp1] + [kin[name] for name in _OPERAND_ORDER]
    in_specs = [_full_spec(xp1)] + [
        pl.BlockSpec(memory_space=pl.ANY) if name in _HBM_OPERANDS
        else _full_spec(kin[name])
        for name in _OPERAND_ORDER]

    return pl.pallas_call(
        functools.partial(_vgg_cnnc_kernel, roll_jnp_like),
        out_shape=jax.ShapeDtypeStruct((B, 1), jnp.float32),
        in_specs=in_specs,
        out_specs=pl.BlockSpec((B, 1), lambda: (0, 0)),
        scratch_shapes=[
            pltpu.VMEM((4, 512, 512), jnp.bfloat16),   # fw1 (async DMA target)
            pltpu.SemaphoreType.DMA(()),               # fw1 DMA completion
            pltpu.VMEM((3, 256, 512), jnp.bfloat16),   # wb3 (async DMA target)
            pltpu.SemaphoreType.DMA(()),               # wb3 DMA completion
            pltpu.VMEM((10 * B, 256), jnp.float32),    # pool1 out == conv2 in (padded)
            pltpu.VMEM((6 * B, 256), jnp.float32),     # pool2 out == conv3 in (padded)
            pltpu.VMEM((4 * B, 512), jnp.float32),     # conv3 out == FC features
        ],
    )(*operands)


# ----------------------------------------------------------------------------
# One-off probe: which `shift` sign of pltpu.roll brings lane l+1 to lane l?
# (Makes the even/odd pooling pairing independent of the rotate convention.)
# ----------------------------------------------------------------------------
def _probe_roll_is_jnp_like():
    def kernel(x_ref, o_ref):
        o_ref[...] = pltpu.roll(x_ref[...], 1, axis=1)

    x = jax.lax.broadcasted_iota(jnp.float32, (8, 128), 1)
    y = pl.pallas_call(
        kernel, out_shape=jax.ShapeDtypeStruct((8, 128), jnp.float32))(x)
    # jnp.roll semantics: roll(+1) puts x[0,0]==0 into [0,1].
    return int(jax.device_get(y)[0, 1]) == 0


# ----------------------------------------------------------------------------
# Host-side (one-time) weight preprocessing: banded conv weights, pooling
# selection matrices, FC1 flatten-permutation.  Weights are kept in PyTorch
# layouts (Conv2d: (Cout, Cin, ky, kx); Linear: (out, in)) and permuted here,
# so real PyTorch checkpoints could be loaded directly.
# ----------------------------------------------------------------------------
def _make_band(w, w_in):
    """w: (Cout, Cin, 3, 3) -> (3, Win*Cin, Win*Cout) banded matrices (per ky)."""
    c_out, c_in = w.shape[0], w.shape[1]
    bands = []
    for ky in range(3):
        acc = jnp.zeros((w_in, w_in, c_in, c_out), jnp.float32)     # (xo, xin, ci, co)
        for kx in range(3):
            eye = jnp.eye(w_in, w_in, k=kx - 1, dtype=jnp.float32)  # xin = xo + kx - 1
            wk = jnp.transpose(w[:, :, ky, kx], (1, 0))             # (Cin, Cout)
            acc = acc + eye[:, :, None, None] * wk[None, None]
        band = jnp.transpose(acc, (1, 2, 0, 3)).reshape(w_in * c_in, w_in * c_out)
        bands.append(band)
    return jnp.stack(bands, 0)


def _xpool_selector(w_in, c):
    """0/1 matrix (Win*C, Wout*C) keeping the even-x phase (lanes are (x, c))."""
    w_out = w_in // 2
    rows = (2 * jnp.arange(w_out)[:, None] * c + jnp.arange(c)[None, :]).reshape(-1)
    cols = (jnp.arange(w_out)[:, None] * c + jnp.arange(c)[None, :]).reshape(-1)
    sel = jnp.zeros((w_in * c, w_out * c), jnp.float32)
    return sel.at[rows, cols].set(1.0)


def _ypool_selector(batch, h_in, parity):
    """0/1 matrix mapping conv rows (y*B+b) to the next stage's y-padded rows."""
    h_out = h_in // 2
    yo = jnp.arange(h_out)[:, None]
    bb = jnp.arange(batch)[None, :]
    rows = ((yo + 1) * batch + bb).reshape(-1)
    cols = ((2 * yo + parity) * batch + bb).reshape(-1)
    sel = jnp.zeros(((h_out + 2) * batch, h_in * batch), jnp.float32)
    return sel.at[rows, cols].set(1.0)


def prepare_kernel_inputs(params, batch):
    bf16 = jnp.bfloat16
    (w1, b1), (w2, b2), (w3, b3) = params["convs"]
    (fw1, fb1), (fw2, fb2) = params["fc"]
    kin = {
        "wb1": _make_band(w1, 16).astype(bf16),            # (3, 16, 512)
        "bb1": jnp.tile(b1, 16).reshape(1, -1),            # (1, 512) f32
        "wb2": _make_band(w2, 8).astype(bf16),             # (3, 256, 512)
        "bb2": jnp.tile(b2, 8).reshape(1, -1),
        "wb3": _make_band(w3, 4).astype(bf16),             # (3, 256, 512)
        "bb3": jnp.tile(b3, 4).reshape(1, -1),
        "sx1": _xpool_selector(16, 32).astype(bf16),       # (512, 256)
        "sx2": _xpool_selector(8, 64).astype(bf16),        # (512, 256)
        "sy1e": _ypool_selector(batch, 16, 0).astype(bf16),   # (10B, 16B)
        "sy1o": _ypool_selector(batch, 16, 1).astype(bf16),
        "sy2e": _ypool_selector(batch, 8, 0).astype(bf16),    # (6B, 8B)
        "sy2o": _ypool_selector(batch, 8, 1).astype(bf16),
        # FC1: PyTorch (512, 2048) with in-index = c*16 + y*4 + x; kernel feature
        # rows are y-major / batch-minor with lanes (x, c), so fold the flatten
        # permutation into a (4, 512, 512) weight: h[b] = sum_y a3[y*B+b] @ fw1[y].
        "fw1": fw1.reshape(512, 128, 4, 4).transpose(2, 3, 1, 0)
                   .reshape(4, 4 * 128, 512).astype(bf16),
        "fb1": fb1.reshape(1, 512),
        "fw2": fw2.reshape(1, 512),                        # f32 (VPU path)
        "fb2": fb2.reshape(1, 1),
    }
    return kin


# ----------------------------------------------------------------------------
# Parameter init (PyTorch layouts; kaiming_uniform_ weights, default-init bias)
# ----------------------------------------------------------------------------
def init_params(key, cfg, in_channels=1):
    params = {"convs": [], "fc": []}
    c_in = in_channels
    for v in cfg:
        if v == "M":
            continue
        key, kw, kb = jax.random.split(key, 3)
        fan_in = c_in * 9
        bw = (6.0 / fan_in) ** 0.5
        w = jax.random.uniform(kw, (v, c_in, 3, 3), jnp.float32, -bw, bw)
        bb = 1.0 / fan_in ** 0.5
        b = jax.random.uniform(kb, (v,), jnp.float32, -bb, bb)
        params["convs"].append((w, b))
        c_in = v
    for (fo, fi) in [(512, 128 * 4 * 4), (1, 512)]:
        key, kw, kb = jax.random.split(key, 3)
        bw = (6.0 / fi) ** 0.5
        w = jax.random.uniform(kw, (fo, fi), jnp.float32, -bw, bw)
        bb = 1.0 / fi ** 0.5
        b = jax.random.uniform(kb, (fo,), jnp.float32, -bb, bb)
        params["fc"].append((w, b))
    return params


# ----------------------------------------------------------------------------
# Plain-JAX reference (for a loose self-check; the kernel uses bf16 MXU operands)
# ----------------------------------------------------------------------------
def reference_forward(params, x_nchw, cfg):
    x = x_nchw[:, 0:1, :, :].astype(jnp.float32)
    ci = 0
    for v in cfg:
        if v == "M":
            x = jax.lax.reduce_window(x, -jnp.inf, jax.lax.max,
                                      (1, 1, 2, 2), (1, 1, 2, 2), "VALID")
        else:
            w, b = params["convs"][ci]
            ci += 1
            x = jax.lax.conv_general_dilated(
                x, w, (1, 1), ((1, 1), (1, 1)),
                dimension_numbers=("NCHW", "OIHW", "NCHW"))
            x = jnp.maximum(x + b[None, :, None, None], 0.0)
    feat = x.reshape(x.shape[0], -1)
    w1, b1 = params["fc"][0]
    w2, b2 = params["fc"][1]
    h = jnp.maximum(feat @ w1.T + b1, 0.0)
    return h @ w2.T + b2


# ----------------------------------------------------------------------------
if __name__ == "__main__":
    cfg = [32, "M", 64, "M", 128]    # 16x16 -> 8x8 -> 4x4, 128 ch => 128*4*4
    dropout = 0.5                    # inference: identity

    key = jax.random.PRNGKey(0)
    kp, kx = jax.random.split(key)
    params = init_params(kp, cfg, in_channels=1)

    # Input mirrors PyTorch NCHW; channel dim > 1 exercises the slicing branch.
    x = jax.random.normal(kx, (2, 4, 16, 16), jnp.float32)

    kin = prepare_kernel_inputs(params, batch=x.shape[0])
    roll_jnp_like = _probe_roll_is_jnp_like()
    fwd = jax.jit(functools.partial(vgg_cnnc_forward, roll_jnp_like=roll_jnp_like))
    out = fwd(kin, x)
    jax.block_until_ready(out)
    assert out.shape == (2, 1), out.shape

    # Loose numerical check against the plain-JAX f32 reference.
    ref = reference_forward(params, x, cfg)
    np.testing.assert_allclose(np.asarray(out), np.asarray(ref),
                               rtol=0.15, atol=0.4)
    print("KERNEL_OK")
</pallas_src>

<mosaic_0001>
module attributes {stable_mosaic.version = 11 : i64} {
  func.func @kernel(%arg0: memref<8x128xf32, #tpu.memory_space<vmem>>, %arg1: memref<8x128xf32, #tpu.memory_space<vmem>>) attributes {dimension_semantics = [], scalar_prefetch = 0 : i64, scratch_operands = 0 : i64, tpu.core_type = #tpu.core_type<tc>} {
    %c0 = arith.constant 0 : index
    %c0_0 = arith.constant 0 : index
    %0 = vector.load %arg0[%c0, %c0_0] : memref<8x128xf32, #tpu.memory_space<vmem>>, vector<8x128xf32>
    %c1_i32 = arith.constant 1 : i32
    %1 = tpu.dynamic_rotate %0 by %c1_i32 dim 1 : vector<8x128xf32>, i32 -> vector<8x128xf32>
    %c0_1 = arith.constant 0 : index
    %c0_2 = arith.constant 0 : index
    %2 = vector.load %arg1[%c0_1, %c0_2] : memref<8x128xf32, #tpu.memory_space<vmem>>, vector<8x128xf32>
    tpu.vector_store %arg1[%c0_1, %c0_2], %1 {strides = array<i32>} : memref<8x128xf32, #tpu.memory_space<vmem>>, vector<8x128xf32>,
    return
  }
}

</mosaic_0001>

<bundles_post_ra>
// kernel: tpu_custom_call.1
= control target key start
LH: loop header
LB: loop body
LE: loop exit
PB: predicated region body
PF: predicated region fallthrough
CT: control target
= control target key end

     0   :  { %6 = vsyncpa [#allocation3], 0  ;;  %s106_s0 = inlined_call_operand.hbm [shape: f32[8,128], index: 0, kind: input, shape index: {}]   ;;  %s107_s1 = inlined_call_operand.hbm [shape: f32[8,128], index: 1, kind: output, shape index: {}]  }
   0x1   :  { %7 = vsyncpa [#allocation4], 0  ;;  %s87_s6 = smov [#allocation2]  }
   0x2   :  { %s14_s7 = sshll.u32 %s87_s6, 4  ;;  %s15_s7 = int_to_ptr.vmem [resolvable:$true] %s14_s7 }
   0x3   :  { %s51_s8 = scalar_lea.vmem %s15_s7, 128  ;;  %p56_p1 = scmp.lt.s32.totalorder %s15_s7, %s15_s7 }
   0x4   :  { %p52_p0 = scmp.ne.s32.totalorder %s15_s7, %s51_s8  ;;  %p57_p2 = scmp.lt.s32.totalorder %s51_s8, %s51_s8 }
   0x6   :  { %p58_p3 = por %p57_p2, %p56_p1 }
   0x8   :  { %p59_p4 = pnand %p58_p3, %p52_p0 }
   0xa   :  { %62 = shalt.err (!%p59_p4)
}
   0xb   :  { %17 = dma.hbm_to_vmem [thread:$0]  %s106_s0, 128, %s15_s7, [#allocation3]  }
   0xc   :  { %83 = dma.done.wait [#allocation3], 128  }
   0xd   :  { %84 = vsyncadd [#allocation3], 4294967168  ;;  %v21_v0 = vld [vmem:[#allocation2] sm:$0xff]  ;;  %s88_s11 = smov 1   ;;  %s89_s12 = smov [#allocation5]  }
   0xe   :  { %22 = vrot.lane.b32.xlu0 %v21_v0, %s88_s11  ;;  %s31_s13 = sshll.u32 %s89_s12, 4  ;;  %s32_s13 = int_to_ptr.vmem [resolvable:$true] %s31_s13 }
   0xf   :  { %s63_s14 = scalar_lea.vmem %s32_s13, 128  ;;  %p68_p6 = scmp.lt.s32.totalorder %s32_s13, %s32_s13 }
  0x10   :  { %p64_p5 = scmp.ne.s32.totalorder %s32_s13, %s63_s14  ;;  %p69_p7 = scmp.lt.s32.totalorder %s63_s14, %s63_s14 }
  0x12   :  { %p70_p8 = por %p69_p7, %p68_p6 }
  0x14   :  { %p71_p9 = pnand %p70_p8, %p64_p5 }
  0x80   :  { %v23_v1 = vpop.permute.xlu0 %22 }
  0x81   :  { %24 = vst [vmem:[#allocation5] sm:$0xff] %v23_v1 }
  0x82   :  { %74 = shalt.err (!%p71_p9)
}
  0x83   :  { %34 = dma.vmem_to_hbm [thread:$0]  %s32_s13, 128, %s107_s1, [#allocation4]  }
  0x84   :  { %85 = dma.done.wait [#allocation4], 128  }
  0x85   :  { %86 = vsyncadd [#allocation4], 4294967168 }
  0x86   :  { %38 = vsyncpa [#allocation3], 1 }
  0x87   :  { %39 = vsyncpa [#allocation4], 1 }

</bundles_post_ra>
